<compile_context>
chip_gen: v6e
topology: v6e:2x2x1
jax: 0.10.0
libtpu: 0.0.40
codegen_flags: <defaults>
</compile_context>

<pallas_src>
import math
import jax
import jax.numpy as jnp
from jax.experimental import pallas as pl
from jax.experimental.pallas import tpu as pltpu


_LANE = 128
# Target per-block VMEM footprint.  Measured mem-bound kernels are at ~85% of
# the HBM roofline already with ~1-4 MiB tiles; bigger blocks only reduce the
# number of pipeline stages (worse read/write overlap, no megacore split).
_BLOCK_BUDGET_BYTES = 4 * 1024 * 1024
# Above this per-element (C, HW) footprint a single-pass block can no longer be
# double-buffered (input + output) within v7x's 64 MiB VMEM -> two-pass path.
_SINGLE_PASS_MAX_ELEM_BYTES = 12 * 1024 * 1024


def _round_up(n, m):
    return -(-n // m) * m


def _sublane_tile(dtype):
    # VMEM second-to-last-dim tiling: 8 for 32-bit, 16 for 16-bit, 32 for 8-bit.
    return max(8, 32 // jnp.dtype(dtype).itemsize)


def _vmem_limit_bytes(block_bytes):
    """Generation-aware scoped-VMEM request (keeps double-buffering intact)."""
    try:
        phys = int(pltpu.get_tpu_info().vmem_capacity_bytes)
    except Exception:
        phys = 64 * 1024 * 1024          # conservative default (v7x per-TC VMEM)
    want = 4 * block_bytes + (4 << 20)   # in + out, double-buffered, + headroom
    return int(min(max(32 << 20, want), phys - (8 << 20)))


# --------------------------- single-pass kernel ------------------------------
def _feature_drop_kernel(x_ref, frac_ref, o_ref):
    """x_ref / o_ref: (tb, C, HW) tile in VMEM; frac_ref: (1,) f32 in SMEM."""
    x = x_ref[...]
    # Channel-mean attention accumulated in f32 (identical for f32 inputs,
    # slightly more accurate than PyTorch's in-dtype mean for bf16).
    att = jnp.mean(x, axis=1, keepdims=True, dtype=jnp.float32)   # (tb, 1, HW)
    max_val = jnp.max(att, axis=-1, keepdims=True)                # (tb, 1, 1)
    threshold = max_val * frac_ref[0]                             # (tb, 1, 1)
    keep = att < threshold                                        # (tb, 1, HW)
    o_ref[...] = jnp.where(keep, x, jnp.zeros_like(x))


# ------------------------- two-pass fallback kernels -------------------------
def _make_mean_max_kernel(hw, thw):
    """Pass 1: per-batch max over HW of the channel mean, HW tiled."""
    def kernel(x_ref, mx_ref):
        b = pl.program_id(0)
        h = pl.program_id(1)

        @pl.when(h == 0)
        def _():
            mx_ref[b] = jnp.full((1, _LANE), -jnp.inf, jnp.float32)

        att = jnp.mean(x_ref[...], axis=1, dtype=jnp.float32)       # (1, thw)
        lane = jax.lax.broadcasted_iota(jnp.int32, att.shape, 1)
        att = jnp.where(h * thw + lane < hw, att, -jnp.inf)         # mask pad lanes
        local = jnp.max(att, axis=-1, keepdims=True)                # (1, 1)
        mx_ref[b] = jnp.maximum(mx_ref[b], jnp.broadcast_to(local, (1, _LANE)))

    return kernel


def _mask_kernel(x_ref, thr_ref, o_ref):
    """Pass 2: apply per-batch threshold mask, (B, HW) tiled."""
    b = pl.program_id(0)
    x = x_ref[...]                                                  # (1, C, thw)
    att = jnp.mean(x, axis=1, keepdims=True, dtype=jnp.float32)     # (1, 1, thw)
    keep = att < thr_ref[b]
    o_ref[...] = jnp.where(keep, x, jnp.zeros_like(x))


# --------------------------------- wrapper -----------------------------------
def feature_drop_decoder_forward(x, drop_frac, *, force_two_pass=False,
                                 donate_x=False):
    """Pallas implementation of FeatureDropDecoder.forward."""
    B, C, H, W = x.shape
    HW = H * W
    dtype_bytes = jnp.dtype(x.dtype).itemsize
    sub = _sublane_tile(x.dtype)

    xr = x.reshape(B, C, HW)                               # metadata-only
    frac = jnp.asarray(drop_frac, jnp.float32).reshape(1)
    aliases = {0: 0} if donate_x else {}

    # VMEM footprint of one (1, C, HW) slab including sublane/lane padding.
    elem_bytes = _round_up(C, sub) * _round_up(HW, _LANE) * dtype_bytes

    if not force_two_pass and elem_bytes <= _SINGLE_PASS_MAX_ELEM_BYTES:
        # ----- single pass: exactly 1x read + 1x write of x -----
        # Keep blocks within the budget AND keep >= ~4 grid steps when B allows
        # so input/output DMAs overlap and v7x can split the batch axis.
        tb = max(1, min(B, _BLOCK_BUDGET_BYTES // elem_bytes, pl.cdiv(B, 4)))
        num_blocks = pl.cdiv(B, tb)
        out = pl.pallas_call(
            _feature_drop_kernel,
            out_shape=jax.ShapeDtypeStruct((B, C, HW), x.dtype),
            grid=(num_blocks,),
            in_specs=[
                pl.BlockSpec((tb, C, HW), lambda b: (b, 0, 0)),
                pl.BlockSpec(memory_space=pltpu.MemorySpace.SMEM),
            ],
            out_specs=pl.BlockSpec((tb, C, HW), lambda b: (b, 0, 0)),
            compiler_params=pltpu.CompilerParams(
                dimension_semantics=("parallel",),
                vmem_limit_bytes=_vmem_limit_bytes(tb * elem_bytes),
            ),
            input_output_aliases=aliases,
        )(xr, frac)
        return out.reshape(B, C, H, W)

    # ----- two-pass fallback: huge per-element (C, HW) tiles -----
    row_bytes = _round_up(C, sub) * dtype_bytes
    thw = max(_LANE, (_BLOCK_BUDGET_BYTES // row_bytes) // _LANE * _LANE)
    thw = min(thw, _round_up(HW, _LANE))
    num_hw_blocks = pl.cdiv(HW, thw)
    vmem_limit = _vmem_limit_bytes(row_bytes * thw)

    # Pass 1: per-batch max of the channel-mean attention (resident accumulator).
    mx = pl.pallas_call(
        _make_mean_max_kernel(HW, thw),
        out_shape=jax.ShapeDtypeStruct((B, 1, _LANE), jnp.float32),
        grid=(B, num_hw_blocks),
        in_specs=[pl.BlockSpec((1, C, thw), lambda b, h: (b, 0, h))],
        out_specs=pl.BlockSpec((B, 1, _LANE), lambda b, h: (0, 0, 0)),
        compiler_params=pltpu.CompilerParams(
            dimension_semantics=("arbitrary", "arbitrary"),
            vmem_limit_bytes=vmem_limit,
        ),
    )(xr)
    threshold = mx[:, 0, 0] * jnp.asarray(drop_frac, jnp.float32)   # (B,)

    # Pass 2: apply the per-batch threshold mask.
    out = pl.pallas_call(
        _mask_kernel,
        out_shape=jax.ShapeDtypeStruct((B, C, HW), x.dtype),
        grid=(B, num_hw_blocks),
        in_specs=[
            pl.BlockSpec((1, C, thw), lambda b, h: (b, 0, h)),
            pl.BlockSpec(memory_space=pltpu.MemorySpace.SMEM),
        ],
        out_specs=pl.BlockSpec((1, C, thw), lambda b, h: (b, 0, h)),
        compiler_params=pltpu.CompilerParams(
            dimension_semantics=("parallel", "parallel"),
            vmem_limit_bytes=vmem_limit,
        ),
        input_output_aliases=aliases,
    )(xr, threshold)
    return out.reshape(B, C, H, W)


def init_params(key, conv_in_ch, num_classes):
    """Parameters from __init__ (upsample 1x1 conv).  NOT used in forward, but
    initialized deterministically for shape fidelity (kaiming-normal-ish)."""
    # TODO(synk): PixelShuffle submodule of `upsample` is unused in forward and undefined here.
    fan_in = conv_in_ch * 1 * 1
    std = math.sqrt(2.0 / fan_in)
    w = jax.random.normal(key, (num_classes, conv_in_ch, 1, 1), jnp.float32) * std
    return {"upsample_conv1x1_weight": w}


def reference_forward(x, drop_frac):
    """Pure-JAX reference matching the PyTorch semantics."""
    attention = jnp.mean(x, axis=1, keepdims=True)                 # (B,1,H,W)
    max_val = jnp.max(attention.reshape(x.shape[0], -1), axis=1)   # (B,)
    threshold = (max_val * drop_frac).reshape(-1, 1, 1, 1)
    drop_mask = (attention < threshold).astype(x.dtype)
    return x * drop_mask


if __name__ == "__main__":
    key = jax.random.PRNGKey(0)
    k_x, k_frac, k_w = jax.random.split(key, 3)

    B, C, H, W = 2, 4, 16, 16
    x = jax.random.normal(k_x, (B, C, H, W), jnp.float32)

    # np.random.uniform(0.7, 0.9) in the PyTorch module -> deterministic JAX draw.
    drop_frac = jax.random.uniform(k_frac, (), jnp.float32, minval=0.7, maxval=0.9)

    # __init__ parameters (unused by forward).
    params = init_params(k_w, conv_in_ch=C, num_classes=3)

    ref = reference_forward(x, drop_frac)

    # Primary single-pass path.
    out = jax.block_until_ready(feature_drop_decoder_forward(x, drop_frac))
    assert out.shape == x.shape
    assert jnp.allclose(out, ref, atol=1e-5, rtol=1e-5)

    # Exercise the two-pass (HW-tiled) fallback path as well.
    out2 = jax.block_until_ready(
        feature_drop_decoder_forward(x, drop_frac, force_two_pass=True))
    assert jnp.allclose(out2, ref, atol=1e-5, rtol=1e-5)

    print("KERNEL_OK")
</pallas_src>

<mosaic_0001>
module attributes {stable_mosaic.version = 11 : i64} {
  func.func @_feature_drop_kernel(%arg0: i32, %arg1: memref<1x4x256xf32, #tpu.memory_space<vmem>>, %arg2: memref<1xf32, #tpu.memory_space<smem>>, %arg3: memref<1x4x256xf32, #tpu.memory_space<vmem>>) attributes {dimension_semantics = [#tpu.dimension_semantics<parallel>], iteration_bounds = array<i64: 2>, scalar_prefetch = 0 : i64, scratch_operands = 0 : i64, tpu.core_type = #tpu.core_type<tc>, window_params = [{transform_indices = @transform_0, window_bounds = array<i64: 1, 4, 256>}, {transform_indices = @transform_1, window_bounds = array<i64: 1>}, {transform_indices = @transform_2, window_bounds = array<i64: 1, 4, 256>}]} {
    %c0 = arith.constant 0 : index
    %c0_0 = arith.constant 0 : index
    %c0_1 = arith.constant 0 : index
    %0 = vector.load %arg1[%c0, %c0_0, %c0_1] : memref<1x4x256xf32, #tpu.memory_space<vmem>>, vector<1x4x256xf32>
    %cst = arith.constant dense<0.000000e+00> : vector<1x256xf32>
    %1 = vector.multi_reduction <add>, %0, %cst [1] : vector<1x4x256xf32> to vector<1x256xf32>
    %2 = vector.shape_cast %1 : vector<1x256xf32> to vector<1x1x256xf32>
    %cst_2 = arith.constant 4.000000e+00 : f32
    %3 = vector.broadcast %cst_2 : f32 to vector<1x1x256xf32>
    %4 = arith.divf %2, %3 : vector<1x1x256xf32>
    %cst_3 = arith.constant dense<0xFF800000> : vector<1x1xf32>
    %5 = vector.multi_reduction <maximumf>, %4, %cst_3 [2] : vector<1x1x256xf32> to vector<1x1xf32>
    %6 = vector.shape_cast %5 : vector<1x1xf32> to vector<1x1x1xf32>
    %c0_4 = arith.constant 0 : index
    %7 = memref.load %arg2[%c0_4] : memref<1xf32, #tpu.memory_space<smem>>
    %8 = vector.broadcast %7 : f32 to vector<1x1x1xf32>
    %9 = arith.mulf %6, %8 : vector<1x1x1xf32>
    %10 = vector.broadcast %9 : vector<1x1x1xf32> to vector<1x1x256xf32>
    %11 = arith.cmpf olt, %4, %10 : vector<1x1x256xf32>
    %cst_5 = arith.constant 0.000000e+00 : f32
    %12 = vector.broadcast %cst_5 : f32 to vector<1x4x256xf32>
    %13 = vector.shape_cast %11 : vector<1x1x256xi1> to vector<1x1x256xi1>
    %14 = vector.broadcast %13 : vector<1x1x256xi1> to vector<1x4x256xi1>
    %15 = arith.select %14, %0, %12 : vector<1x4x256xi1>, vector<1x4x256xf32>
    %c0_6 = arith.constant 0 : index
    %c0_7 = arith.constant 0 : index
    %c0_8 = arith.constant 0 : index
    %16 = vector.load %arg3[%c0_6, %c0_7, %c0_8] : memref<1x4x256xf32, #tpu.memory_space<vmem>>, vector<1x4x256xf32>
    tpu.vector_store %arg3[%c0_6, %c0_7, %c0_8], %15 {strides = array<i32>} : memref<1x4x256xf32, #tpu.memory_space<vmem>>, vector<1x4x256xf32>,
    return
  }
  func.func @transform_0(%arg0: i32) -> (i32, i32, i32) {
    %c0_i32 = arith.constant 0 : i32
    %c0_i32_0 = arith.constant 0 : i32
    %c0_i32_1 = arith.constant 0 : i32
    return %arg0, %c0_i32, %c0_i32_0 : i32, i32, i32
  }
  func.func @transform_1(%arg0: i32) -> i32 {
    %c0_i32 = arith.constant 0 : i32
    %c0_i32_0 = arith.constant 0 : i32
    return %c0_i32 : i32
  }
  func.func @transform_2(%arg0: i32) -> (i32, i32, i32) {
    %c0_i32 = arith.constant 0 : i32
    %c0_i32_0 = arith.constant 0 : i32
    %c0_i32_1 = arith.constant 0 : i32
    return %arg0, %c0_i32, %c0_i32_0 : i32, i32, i32
  }
}

</mosaic_0001>

<bundles_post_ra>
// kernel: tpu_custom_call.1
= control target key start
LH: loop header
LB: loop body
LE: loop exit
PB: predicated region body
PF: predicated region fallthrough
CT: control target
= control target key end

     0   :  { %s609_s0 = inlined_call_operand.hbm [shape: f32[2,4,256], index: 0, kind: input, shape index: {}]   ;;  %s610_s1 = inlined_call_operand.<no memory space> [shape: f32[1], index: 1, kind: input, shape index: {}]   ;;  %s611_s2 = inlined_call_operand.hbm [shape: f32[2,4,256], index: 2, kind: output, shape index: {}]  }
   0x1   :  { %7 = sst [smem:[#allocation2]] %s610_s1 }
   0x2   :  { %8 = vsyncpa [#allocation4], 0 }
   0x3   :  { %10 = vsyncpa [#allocation4 + $0x1], 0 }
   0x4   :  { %11 = vsyncpa [#allocation5], 0 }
   0x5   :  { %13 = vsyncpa [#allocation5 + $0x1], 0  ;;  %s464_s11 = smov 0   ;;  %s466_s12 = smov 0  }
   0x6   :  { %s468_s13 = smov 0   ;;  %s470_s14 = smov 0  }
   0x7 LB: > { %s485_s1 = sadd.s32 4294967295, %s442_s14   ;;  %s287_s15 = sadd.s32 4294967294, %s442_s14   ;;  %s442_s14 = sphi %s470_s14, %s628_s14   ;;  %s438_s13 = sphi %s468_s13, %s627_s13   ;;  %s434_s12 = sphi %s466_s12, %s626_s12   ;;  %s430_s11 = sphi %s464_s11, %s625_s11  }
   0x8   : > { %s489_s16 = sadd.s32 1, %s442_s14   ;;  %s26_s17 = sadd.s32 1, %s438_s13 }
   0x9   : > { %s23_s18 = ssub.s32 %s442_s14, %s489_s16  ;;  %p33_p0 = scmp.ne.s32.totalorder %s438_s13, %s434_s12 }
   0xa   : > { %p24_p1 = scmp.eq.s32.totalorder %s23_s18, 0  ;;  %p34_p2 = scmp.eq.s32.totalorder %s442_s14, 0 }
   0xb   : > { %p39_p3 = scmp.ne.s32.totalorder %s434_s12, %s430_s11  ;;  %p40_p4 = scmp.eq.s32.totalorder %s485_s1, 0 }
   0xc   : > { %s501_s19 = scalar_select %p24_p1, %s438_s13, %s26_s17  }
   0xd   : > { %p503_p5 = por %p34_p2, %p33_p0  ;;  %p507_p6 = por %p40_p4, %p39_p3 }
   0xe   : > { %p84_p7 = scmp.eq.s32.totalorder %s485_s1, 1  ;;  %p90_p8 = scmp.eq.s32.totalorder %s287_s15, 1 }
   0xf   : > { %s615_s21 = scalar_select %p507_p6, 1, 0 }
  0x10   : > { %p315_p10 = scmp.lt.s32.totalorder %s442_s14, 2  ;;  %p514_p11 = por %p84_p7, %p33_p0 }
  0x11   : > { %p518_p12 = por %p90_p8, %p39_p3  ;;  %s113_s24 = sand.u32 1, %s438_s13  }
  0x12   : > { %s616_s22 = scalar_select %p514_p11, 1, 0 }
  0x13   : > { %s617_s23 = scalar_select %p518_p12, 1, 0 }
  0x14   : > { %s301_s25 = sshll.u32 %s442_s14, 7  ;;  %s290_s26 = sshll.u32 %s113_s24, 3 }
  0x15   : > { %s527_s29 = scalar_lea.hbm %s609_s0, %s301_s25  ;;  %s117_s30 = scalar_lea.vmem [#allocation3], %s290_s26 }
  0x16   : > { %s125_s3 = sshll.u32 %s117_s30, 4  ;;  %p531_p13 = pnand %p315_p10, %p503_p5  ;;  %s535_s3 = int_to_ptr.vmem [resolvable:$true] %s125_s3 }
  0x17   : > { %s114_s5 = scalar_lea.sflag [#allocation4], %s113_s24  ;;  %s350_s6 = scalar_lea.hbm %s527_s29, 128 }
  0x18   : > { %p351_p2 = scmp.ne.s32.totalorder %s527_s29, %s350_s6  ;;  %p352_p3 = pneg %p531_p13 }
  0x19   : > { %s355_s9 = scalar_lea.hbm %s609_s0, 256  ;;  %p356_p5 = scmp.lt.s32.totalorder %s527_s29, %s609_s0 }
  0x1a   : > { %p353_p4 = pnand %p352_p3, %p351_p2  ;;  %p357_p8 = scmp.lt.s32.totalorder %s355_s9, %s350_s6 }
  0x1c   : > { %p354_p7 = pneg %p353_p4  ;;  %p358_p10 = por %p357_p8, %p356_p5 }
  0x1e   : > { %p359_p9 = pnand %p358_p10, %p354_p7 }
  0x20   : > { %362 = shalt.err (!%p359_p9)
}
  0x21   : > { %s363_s17 = scalar_lea.vmem %s535_s3, 128  ;;  %s444_s18 = smov [#allocation3]  }
  0x22   : > { %p364_p0 = scmp.ne.s32.totalorder %s535_s3, %s363_s17  ;;  %s368_s20 = sshll.u32 %s444_s18, 4  ;;  %s369_s20 = int_to_ptr.vmem [resolvable:$false] %s368_s20 }
  0x23   : > { %s370_s24 = scalar_lea.vmem %s369_s20, 256  ;;  %p371_p4 = scmp.lt.s32.totalorder %s535_s3, %s369_s20 }
  0x24   : > { %p366_p1 = pnand %p364_p0, %p352_p3  ;;  %p372_p12 = scmp.lt.s32.totalorder %s370_s24, %s363_s17 }
  0x26   : > { %p367_p2 = pneg %p366_p1  ;;  %p373_p11 = por %p372_p12, %p371_p4 }
  0x28   : > { %p374_p6 = pnand %p373_p11, %p367_p2 }
  0x2a   : > { %377 = shalt.err (!%p374_p6)
}
  0x2b   : > { %310 = dma.hbm_to_vmem [thread:$0]  (!%p531_p13), %s527_s29, 128, %s535_s3, %s114_s5  }
  0x2c   : > { %p619_p9 = scmp.lt.s32.totalorder %s442_s14, 3  ;;  %p620_p7 = scmp.ge.s32.totalorder %s442_s14, 1 }
  0x2e   : > { %p131_p0 = pnand %p620_p7, %p619_p9 }
  0x2f   : > { %s562_s25 = sand.u32 (!%p131_p0), 1, %s434_s12   ;;  %p621_p6 = scmp.ne.s32.totalorder (!%p131_p0), %s615_s21, 0 }
  0x30   : > { %134 = sbr.rel (%p131_p0) target bundleno = 231 (0xe7), region = 28  ;;  %s294_s26 = sshll.u32 (!%p131_p0), %s562_s25, 3 }
  0x31   : > { %s137_s27 = scalar_lea.sflag (!%p131_p0), [#allocation4], %s562_s25  ;;  %s140_s28 = scalar_lea.vmem (!%p131_p0), [#allocation3], %s294_s26 }
  0x35   : > { %421 = dma.done.wait (%p621_p6), %s137_s27, 128  }
  0x36   : > { %423 = vsyncadd (%p621_p6), %s137_s27, 4294967168  ;;  %vm165_vm0 = vcmask 1043456   ;;  %v161_v0 = vld [vmem:[%s140_s28] sm:$0xff]  ;;  %s186_s21 = sld [smem:[#allocation2]]  ;;  %s302_s29 = sshll.u32 %s485_s1, 7 }
  0x37   : > { %v163_v1 = vcombine.high %v161_v0, %v161_v0  ;;  %v166_v2 = vsel %vm165_vm0, %v161_v0, 0.0  ;;  %s160_s30 = scalar_lea.vmem [#allocation6], %s294_s26  ;;  %s215_s6 = scalar_lea.hbm %s611_s2, %s302_s29 }
  0x38   : > { %v167_v3 = vrot.slane %v166_v2, 4  ;;  %s217_s3 = sshll.u32 %s160_s30, 4  ;;  %s203_s7 = scalar_lea.sflag [#allocation5], %s562_s25  ;;  %s218_s3 = int_to_ptr.vmem [resolvable:$true] %s217_s3 }
  0x39   : > { %v173_v4 = vsel %vm165_vm0, %v163_v1, 0.0  ;;  %s378_s8 = scalar_lea.vmem %s218_s3, 128  ;;  %p622_p12 = scmp.ne.s32.totalorder %s616_s22, 0 }
  0x3a   : > { %v168_v5 = vadd.f32 %v167_v3, %v166_v2  ;;  %v174_v6 = vrot.slane %v173_v4, 4  ;;  %p379_p11 = scmp.ne.s32.totalorder %s218_s3, %s378_s8  ;;  %s445_s1 = smov [#allocation6]  }
  0x3b   : > { %s382_s9 = sshll.u32 %s445_s1, 4  ;;  %s383_s9 = int_to_ptr.vmem [resolvable:$false] %s382_s9 }
  0x3c   : > { %v169_v7 = vrot.slane %v168_v5, 2  ;;  %v175_v8 = vadd.f32 %v174_v6, %v173_v4  ;;  %v187_v19 = vstv %s186_s21  ;;  %p380_p13 = pnand %p379_p11, %p622_p12  ;;  %s384_s10 = scalar_lea.vmem %s383_s9, 256 }
  0x3d   : > { %p385_p3 = scmp.lt.s32.totalorder %s218_s3, %s383_s9  ;;  %p386_p5 = scmp.lt.s32.totalorder %s384_s10, %s378_s8 }
  0x3e   : > { %v170_v9 = vadd.f32 %v169_v7, %v168_v5  ;;  %v176_v10 = vrot.slane %v175_v8, 2  ;;  %p381_p1 = pneg %p380_p13 }
  0x3f   : > { %p387_p8 = por %p386_p5, %p385_p3 }
  0x40   : > { %v171_v11 = vrot.slane %v170_v9, 1  ;;  %v177_v12 = vadd.f32 %v176_v10, %v175_v8 }
  0x41   : > { %p388_p10 = pnand %p387_p8, %p381_p1 }
  0x42   : > { %v172_v13 = vadd.f32 %v171_v11, %v170_v9  ;;  %v178_v14 = vrot.slane %v177_v12, 1 }
  0x44   : > { %v179_v15 = vadd.f32 %v178_v14, %v177_v12  ;;  %v181_v16 = vmul.f32 0.25, %v172_v13 }
  0x46   : > { %v182_v17 = vmul.f32 0.25, %v179_v15 }
  0x48   : > { %v183_v18 = vmax.f32 %v181_v16, %v182_v17 }
  0x4a   : > { %184 = vmax.xlane.f32.xlu0 %v183_v18 }
  0xd3   : > { %v185_v20 = vpop.xlane.xlu0 %184 }
  0xd4   : > { %v188_v21 = vmul.f32 %v187_v19, %v185_v20 }
  0xd6   : > { %vm189_vm1 = vcmp.lt.f32.partialorder %v181_v16, %v188_v21  ;;  %vm190_vm2 = vcmp.lt.f32.partialorder %v182_v17, %v188_v21 }
  0xd7   : > { %v195_v22 = vsel %vm189_vm1, %v161_v0, 0.0  ;;  %v196_v23 = vsel %vm190_vm2, %v163_v1, 0.0 }
  0xd8   : > { %v199_v24 = vcombine.low %v195_v22, %v196_v23 }
  0xda   : > { %201 = vst [vmem:[%s160_s30] sm:$0xff] %v199_v24 }
  0xdb   : > { %391 = shalt.err (!%p388_p10)
}
  0xdc   : > { %s392_s15 = scalar_lea.hbm %s215_s6, 128  ;;  %s396_s20 = scalar_lea.hbm %s611_s2, 256 }
  0xdd   : > { %p393_p2 = scmp.ne.s32.totalorder %s215_s6, %s392_s15  ;;  %p397_p7 = scmp.lt.s32.totalorder %s215_s6, %s611_s2 }
  0xde   : > { %p398_p0 = scmp.lt.s32.totalorder %s396_s20, %s392_s15 }
  0xdf   : > { %p394_p4 = pnand %p393_p2, %p622_p12 }
  0xe0   : > { %p399_p6 = por %p398_p0, %p397_p7 }
  0xe1   : > { %p395_p9 = pneg %p394_p4 }
  0xe3   : > { %p400_p11 = pnand %p399_p6, %p395_p9 }
  0xe5   : > { %403 = shalt.err (!%p400_p11)
}
  0xe6   : > { %305 = dma.vmem_to_hbm [thread:$0]  (%p622_p12), %s218_s3, 128, %s215_s6, %s203_s7  }
  0xe7 PF: > { %s229_s26 = sand.u32 1, %s430_s11   ;;  %p623_p13 = scmp.ne.s32.totalorder %s617_s23, 0 }
  0xe8   : > { %p624_p1 = scmp.ge.s32.totalorder %s442_s14, 2  ;;  %s230_s27 = scalar_lea.sflag [#allocation5], %s229_s26 }
  0xea   : > { %p312_p3 = pnand %p624_p1, %p623_p13 }
  0xec   : > { %p313_p5 = pneg %p312_p3 }
  0xee   : > { %425 = dma.done.wait (%p313_p5), %s230_s27, 128  }
  0xef   : > { %427 = vsyncadd (%p313_p5), %s230_s27, 4294967168  ;;  %p16_p8 = scmp.ge.s32.totalorder %s489_s16, 4   ;;  %s625_s11 = smov %s434_s12 }
  0xf0   : > { %s626_s12 = smov %s438_s13  ;;  %s627_s13 = smov %s501_s19 }
  0xf1   : > { %s628_s14 = smov %s489_s16  ;;  %18 = sbr.rel (!%p16_p8) target bundleno = 7 (0x7), region = 73 }
  0xf6   :  { %235 = vsyncpa [#allocation4], 1 }
  0xf7   :  { %237 = vsyncpa [#allocation4 + $0x1], 1 }
  0xf8   :  { %238 = vsyncpa [#allocation5], 1 }
  0xf9   :  { %240 = vsyncpa [#allocation5 + $0x1], 1 }

</bundles_post_ra>
